<compile_context>
chip_gen: v7x
topology: tpu7x:2x2x1
jax: 0.10.0
libtpu: 0.0.40
codegen_flags: <defaults>
</compile_context>

<pallas_src>
import functools

import jax
import jax.numpy as jnp
from jax.experimental import pallas as pl
from jax.experimental.pallas import tpu as pltpu


def _round_up(x, m):
    return ((x + m - 1) // m) * m


def _lmf_kernel(e_ref, n_ref, w_ref, brow_ref, s_ref, bias_ref, out_ref, *, ro):
    # Concatenate the two modality tiles along lanes (in 32-bit layout, then cast back
    # to the streaming dtype) so both projections run in ONE MXU matmul.
    x = jnp.concatenate(
        [e_ref[...].astype(jnp.float32), n_ref[...].astype(jnp.float32)], axis=-1)
    x = x.astype(w_ref.dtype)
    # Fused block-diagonal matmul: lanes [0, RO) = eeg projection, [RO, 2RO) = nirs.
    fused = jnp.dot(x, w_ref[...], preferred_element_type=jnp.float32) + brow_ref[...]
    fe = fused[:, :ro]
    fn = fused[:, ro:]
    zy = fe * fn                                              # (bm, RO) f32, lane-dense
    # Weighted rank-sum folded into one (RO, O_pad) matmul (weights baked into s_ref).
    out = jnp.dot(zy, s_ref[...], preferred_element_type=jnp.float32)
    out_ref[...] = (out + bias_ref[...]).astype(out_ref.dtype)


def lmf_forward(eeg, nirs, eeg_factor, nirs_factor, fusion_weights, fusion_bias,
                *, block_b=512, param_dtype=jnp.bfloat16):
    B, E = eeg.shape
    _, N = nirs.shape
    R, Ep1, O = eeg_factor.shape
    RO = R * O
    O_pad = _round_up(O, 128)            # lane-dense (unmasked) output store

    # ---- wrapper-side layout glue (tiny parameter tensors only; no activation copies) ----
    # (R, D+1, O) -> (D+1, R*O); row 0 corresponds to the implicit "ones" feature.
    fe_all = jnp.transpose(eeg_factor, (1, 0, 2)).reshape(Ep1, RO).astype(jnp.float32)
    fn_all = jnp.transpose(nirs_factor, (1, 0, 2)).reshape(N + 1, RO).astype(jnp.float32)
    # Block-diagonal RHS so both modality projections fuse into one matmul:
    #   rows 0..E-1   x lanes [0, RO)    = eeg factor (weights)
    #   rows E..E+N-1 x lanes [RO, 2RO)  = nirs factor (weights)
    w_blk = jnp.concatenate(
        [jnp.concatenate([fe_all[1:], jnp.zeros((E, RO), jnp.float32)], axis=1),
         jnp.concatenate([jnp.zeros((N, RO), jnp.float32), fn_all[1:]], axis=1)],
        axis=0).astype(param_dtype)
    # "ones"-feature bias rows stay f32 and are added post-accumulation.
    brow = jnp.concatenate([fe_all[0:1], fn_all[0:1]], axis=1)            # (1, 2*RO)
    # Rank-sum matrix with fusion weights folded in: S[r*O + o, o'] = w_r * (o == o'),
    # lane-padded to O_pad so the final store is unmasked.
    s_mat = (fusion_weights[0].astype(jnp.float32)[:, None, None]
             * jnp.eye(O, dtype=jnp.float32)[None]).reshape(RO, O)
    s_mat = jnp.pad(s_mat, ((0, 0), (0, O_pad - O)))
    bias_pad = jnp.pad(fusion_bias.astype(jnp.float32), ((0, 0), (0, O_pad - O)))

    # Activations streamed as param_dtype (bf16 by default) -> halves HBM DMA bytes.
    eeg = eeg.astype(param_dtype)
    nirs = nirs.astype(param_dtype)

    # Batch tile: multiple of 16 (bf16 sublane packing); NO wrapper-side jnp.pad — the
    # ragged trailing block is handled by Pallas partial-block masking.
    block_b = max(16, (block_b // 16) * 16)
    bm = min(block_b, _round_up(B, 16))
    # v7x: ensure a large batch yields >=2 "parallel" grid steps so both TCs are used.
    if B >= 256 and pl.cdiv(B, bm) < 2:
        bm = _round_up(pl.cdiv(B, 2), 16)
    grid = (pl.cdiv(B, bm),)

    p_bytes = jnp.dtype(param_dtype).itemsize
    cost = pl.CostEstimate(
        flops=2 * B * (E + N) * 2 * RO + 3 * B * RO + 2 * B * RO * O_pad + B * O_pad,
        transcendentals=0,
        bytes_accessed=p_bytes * (B * (E + N) + (E + N) * 2 * RO)
        + 4 * (2 * RO + RO * O_pad + O_pad + B * O_pad),
    )

    out = pl.pallas_call(
        functools.partial(_lmf_kernel, ro=RO),
        out_shape=jax.ShapeDtypeStruct((B, O_pad), jnp.float32),
        grid=grid,
        in_specs=[
            pl.BlockSpec((bm, E), lambda i: (i, 0)),           # eeg rows
            pl.BlockSpec((bm, N), lambda i: (i, 0)),           # nirs rows
            pl.BlockSpec((E + N, 2 * RO), lambda i: (0, 0)),   # block-diag factors
            pl.BlockSpec((1, 2 * RO), lambda i: (0, 0)),       # "ones" bias rows
            pl.BlockSpec((RO, O_pad), lambda i: (0, 0)),       # weighted rank-sum
            pl.BlockSpec((1, O_pad), lambda i: (0, 0)),        # fusion bias (padded)
        ],
        out_specs=pl.BlockSpec((bm, O_pad), lambda i: (i, 0)),
        compiler_params=pltpu.CompilerParams(
            dimension_semantics=("parallel",)),
        cost_estimate=cost,
    )(eeg, nirs, w_blk, brow, s_mat, bias_pad)

    return out[:, :O]


def _xavier_uniform(key, shape, dtype=jnp.float32):
    # Simplified xavier (last two dims as fan_in/fan_out); deterministic test init.
    fan_in, fan_out = shape[-2], shape[-1]
    limit = (6.0 / (fan_in + fan_out)) ** 0.5
    return jax.random.uniform(key, shape, dtype, minval=-limit, maxval=limit)


def lmf_reference(eeg, nirs, eeg_factor, nirs_factor, fusion_weights, fusion_bias):
    B = eeg.shape[0]
    ones = jnp.ones((B, 1), dtype=eeg.dtype)
    e = jnp.concatenate([ones, eeg], axis=1)
    n = jnp.concatenate([ones, nirs], axis=1)
    fe = jnp.einsum("bd,rdo->rbo", e, eeg_factor)
    fn = jnp.einsum("bd,rdo->rbo", n, nirs_factor)
    zy = fe * fn
    out = jnp.einsum("r,rbo->bo", fusion_weights[0], zy) + fusion_bias
    return out


if __name__ == "__main__":
    B, E, N, O, R = 4, 16, 8, 32, 4   # R*O = 128 -> lane-dense intermediates

    key = jax.random.PRNGKey(0)
    k_eeg, k_nirs, k_ef, k_nf, k_w, k_e2, k_n2 = jax.random.split(key, 7)

    eeg = jax.random.normal(k_eeg, (B, E), dtype=jnp.float32)
    nirs = jax.random.normal(k_nirs, (B, N), dtype=jnp.float32)

    eeg_factor = _xavier_uniform(k_ef, (R, E + 1, O))
    nirs_factor = _xavier_uniform(k_nf, (R, N + 1, O))
    fusion_weights = _xavier_uniform(k_w, (1, R))
    fusion_bias = jnp.zeros((1, O), dtype=jnp.float32)

    ref = lmf_reference(eeg, nirs, eeg_factor, nirs_factor, fusion_weights, fusion_bias)

    # 1) Default path: bf16 operand streaming, single (partial) batch block.
    out = lmf_forward(eeg, nirs, eeg_factor, nirs_factor, fusion_weights, fusion_bias)
    out = jax.block_until_ready(out)
    assert out.shape == (B, O)
    assert jnp.allclose(out, ref, atol=5e-2, rtol=5e-2), "bf16 path mismatch vs reference"

    # 2) f32 path with a multi-step grid and a ragged trailing block (B=300, bm=128):
    #    exercises the partial-block masking and the multi-tile "parallel" axis.
    B2 = 300
    eeg2 = jax.random.normal(k_e2, (B2, E), dtype=jnp.float32)
    nirs2 = jax.random.normal(k_n2, (B2, N), dtype=jnp.float32)
    out2 = lmf_forward(eeg2, nirs2, eeg_factor, nirs_factor, fusion_weights,
                       fusion_bias, block_b=128, param_dtype=jnp.float32)
    out2 = jax.block_until_ready(out2)
    ref2 = lmf_reference(eeg2, nirs2, eeg_factor, nirs_factor, fusion_weights,
                         fusion_bias)
    assert out2.shape == (B2, O)
    assert jnp.allclose(out2, ref2, atol=2e-2, rtol=2e-2), "f32 path mismatch vs reference"

    print("KERNEL_OK")
</pallas_src>

<mosaic_0001>
module attributes {stable_mosaic.version = 11 : i64} {
  func.func @_lmf_kernel(%arg0: i32, %arg1: memref<16x16xbf16, #tpu.memory_space<vmem>>, %arg2: memref<16x8xbf16, #tpu.memory_space<vmem>>, %arg3: memref<24x256xbf16, #tpu.memory_space<vmem>>, %arg4: memref<1x256xf32, #tpu.memory_space<vmem>>, %arg5: memref<128x128xf32, #tpu.memory_space<vmem>>, %arg6: memref<1x128xf32, #tpu.memory_space<vmem>>, %arg7: memref<16x128xf32, #tpu.memory_space<vmem>>) attributes {dimension_semantics = [#tpu.dimension_semantics<parallel>], iteration_bounds = array<i64: 1>, scalar_prefetch = 0 : i64, scratch_operands = 0 : i64, tpu.core_type = #tpu.core_type<tc>, window_params = [{transform_indices = @transform_0, window_bounds = array<i64: 16, 16>}, {transform_indices = @transform_1, window_bounds = array<i64: 16, 8>}, {pipeline_mode = #tpu.pipeline_mode<synchronous>, transform_indices = @transform_2, window_bounds = array<i64: 24, 256>}, {pipeline_mode = #tpu.pipeline_mode<synchronous>, transform_indices = @transform_3, window_bounds = array<i64: 1, 256>}, {pipeline_mode = #tpu.pipeline_mode<synchronous>, transform_indices = @transform_4, window_bounds = array<i64: 128, 128>}, {pipeline_mode = #tpu.pipeline_mode<synchronous>, transform_indices = @transform_5, window_bounds = array<i64: 1, 128>}, {transform_indices = @transform_6, window_bounds = array<i64: 16, 128>}]} {
    %c0 = arith.constant 0 : index
    %c0_0 = arith.constant 0 : index
    %0 = vector.load %arg1[%c0, %c0_0] : memref<16x16xbf16, #tpu.memory_space<vmem>>, vector<16x16xbf16>
    %1 = arith.extf %0 : vector<16x16xbf16> to vector<16x16xf32>
    %c0_1 = arith.constant 0 : index
    %c0_2 = arith.constant 0 : index
    %2 = vector.load %arg2[%c0_1, %c0_2] : memref<16x8xbf16, #tpu.memory_space<vmem>>, vector<16x8xbf16>
    %3 = arith.extf %2 : vector<16x8xbf16> to vector<16x8xf32>
    %4 = tpu.concatenate %1, %3 in 1 : vector<16x16xf32>, vector<16x8xf32> -> vector<16x24xf32>
    %5 = arith.truncf %4 : vector<16x24xf32> to vector<16x24xbf16>
    %c0_3 = arith.constant 0 : index
    %c0_4 = arith.constant 0 : index
    %6 = vector.load %arg3[%c0_3, %c0_4] : memref<24x256xbf16, #tpu.memory_space<vmem>>, vector<24x256xbf16>
    %cst = arith.constant dense<0.000000e+00> : vector<16x256xf32>
    %7 = tpu.matmul %5, %6, %cst {dimension_numbers = #tpu.dot_dimension_numbers<[1], [0], [0], [1], [0, 0, 1, 1], [], []>} : vector<16x24xbf16>, vector<24x256xbf16>, vector<16x256xf32> -> vector<16x256xf32>
    %c0_5 = arith.constant 0 : index
    %c0_6 = arith.constant 0 : index
    %8 = vector.load %arg4[%c0_5, %c0_6] : memref<1x256xf32, #tpu.memory_space<vmem>>, vector<1x256xf32>
    %9 = vector.broadcast %8 : vector<1x256xf32> to vector<16x256xf32>
    %10 = arith.addf %7, %9 : vector<16x256xf32>
    %11 = vector.extract_strided_slice %10 {offsets = [0, 0], sizes = [16, 128], strides = [1, 1]} : vector<16x256xf32> to vector<16x128xf32>
    %12 = vector.extract_strided_slice %10 {offsets = [0, 128], sizes = [16, 128], strides = [1, 1]} : vector<16x256xf32> to vector<16x128xf32>
    %13 = arith.mulf %11, %12 : vector<16x128xf32>
    %c0_7 = arith.constant 0 : index
    %c0_8 = arith.constant 0 : index
    %14 = vector.load %arg5[%c0_7, %c0_8] : memref<128x128xf32, #tpu.memory_space<vmem>>, vector<128x128xf32>
    %cst_9 = arith.constant dense<0.000000e+00> : vector<16x128xf32>
    %15 = tpu.matmul %13, %14, %cst_9 {dimension_numbers = #tpu.dot_dimension_numbers<[1], [0], [0], [1], [0, 0, 1, 1], [], []>} : vector<16x128xf32>, vector<128x128xf32>, vector<16x128xf32> -> vector<16x128xf32>
    %c0_10 = arith.constant 0 : index
    %c0_11 = arith.constant 0 : index
    %16 = vector.load %arg6[%c0_10, %c0_11] : memref<1x128xf32, #tpu.memory_space<vmem>>, vector<1x128xf32>
    %17 = vector.broadcast %16 : vector<1x128xf32> to vector<16x128xf32>
    %18 = arith.addf %15, %17 : vector<16x128xf32>
    %c0_12 = arith.constant 0 : index
    %c0_13 = arith.constant 0 : index
    %19 = vector.load %arg7[%c0_12, %c0_13] : memref<16x128xf32, #tpu.memory_space<vmem>>, vector<16x128xf32>
    tpu.vector_store %arg7[%c0_12, %c0_13], %18 {strides = array<i32>} : memref<16x128xf32, #tpu.memory_space<vmem>>, vector<16x128xf32>,
    return
  }
  func.func @transform_0(%arg0: i32) -> (i32, i32) {
    %c0_i32 = arith.constant 0 : i32
    %c0_i32_0 = arith.constant 0 : i32
    return %arg0, %c0_i32 : i32, i32
  }
  func.func @transform_1(%arg0: i32) -> (i32, i32) {
    %c0_i32 = arith.constant 0 : i32
    %c0_i32_0 = arith.constant 0 : i32
    return %arg0, %c0_i32 : i32, i32
  }
  func.func @transform_2(%arg0: i32) -> (i32, i32) {
    %c0_i32 = arith.constant 0 : i32
    %c0_i32_0 = arith.constant 0 : i32
    %c0_i32_1 = arith.constant 0 : i32
    return %c0_i32, %c0_i32_0 : i32, i32
  }
  func.func @transform_3(%arg0: i32) -> (i32, i32) {
    %c0_i32 = arith.constant 0 : i32
    %c0_i32_0 = arith.constant 0 : i32
    %c0_i32_1 = arith.constant 0 : i32
    return %c0_i32, %c0_i32_0 : i32, i32
  }
  func.func @transform_4(%arg0: i32) -> (i32, i32) {
    %c0_i32 = arith.constant 0 : i32
    %c0_i32_0 = arith.constant 0 : i32
    %c0_i32_1 = arith.constant 0 : i32
    return %c0_i32, %c0_i32_0 : i32, i32
  }
  func.func @transform_5(%arg0: i32) -> (i32, i32) {
    %c0_i32 = arith.constant 0 : i32
    %c0_i32_0 = arith.constant 0 : i32
    %c0_i32_1 = arith.constant 0 : i32
    return %c0_i32, %c0_i32_0 : i32, i32
  }
  func.func @transform_6(%arg0: i32) -> (i32, i32) {
    %c0_i32 = arith.constant 0 : i32
    %c0_i32_0 = arith.constant 0 : i32
    return %arg0, %c0_i32 : i32, i32
  }
}

</mosaic_0001>

<bundles_post_ra>
// kernel: tpu_custom_call.1
= control target key start
LH: loop header
LB: loop body
LE: loop exit
PB: predicated region body
PF: predicated region fallthrough
CT: control target
= control target key end

     0   :  { %11 = vsyncpa [#allocation3], 0  ;;  %s637_s0 = inlined_call_operand.hbm [shape: bf16[4,16], index: 0, kind: input, shape index: {}]   ;;  %s638_s1 = inlined_call_operand.vmem [shape: bf16[4,8], index: 1, kind: input, shape index: {}]   ;;  %s639_s2 = inlined_call_operand.hbm [shape: bf16[24,256], index: 2, kind: input, shape index: {}]   ;;  %s640_s3 = inlined_call_operand.vmem [shape: f32[1,256], index: 3, kind: input, shape index: {}]   ;;  %s641_s4 = inlined_call_operand.hbm [shape: f32[128,128], index: 4, kind: input, shape index: {}]   ;;  %s642_s5 = inlined_call_operand.vmem [shape: f32[1,128], index: 5, kind: input, shape index: {}]   ;;  %s643_s6 = inlined_call_operand.hbm [shape: f32[4,128], index: 6, kind: output, shape index: {}]  }
   0x1   :  { %12 = vsyncpa [#allocation6], 0 }
   0x2   :  { %13 = vsyncpa [#allocation4], 0 }
   0x3   :  { %18 = vsyncadd [#allocation3], 96  ;;  %s518_s21 = smov [#allocation5]   ;;  %s424_s25 = scalar_lea.hbm %s639_s2, 384 }
   0x4   :  { %s33_s22 = sshll.u32 %s518_s21, 4  ;;  %p425_p0 = scmp.ne.s32.totalorder %s639_s2, %s424_s25  ;;  %s34_s22 = int_to_ptr.vmem [resolvable:$true] %s33_s22 }
   0x5   :  { %p428_p1 = scmp.lt.u32.totalorder %s424_s25, %s639_s2 }
   0x7   :  { %p430_p2 = pnand %p428_p1, %p425_p0 }
   0x9   :  { %433 = shalt.err (!%p430_p2)
}
   0xa   :  { %s434_s30 = scalar_lea.vmem %s34_s22, 384  ;;  %p439_p4 = scmp.lt.s32.totalorder %s34_s22, %s34_s22 }
   0xb   :  { %p435_p3 = scmp.ne.s32.totalorder %s34_s22, %s434_s30  ;;  %p440_p5 = scmp.lt.s32.totalorder %s434_s30, %s434_s30 }
   0xd   :  { %p441_p6 = por %p440_p5, %p439_p4 }
   0xf   :  { %p442_p7 = pnand %p441_p6, %p435_p3 }
  0x11   :  { %445 = shalt.err (!%p442_p7)
}
  0x12   :  { %s519_s7 = smov 128   ;;  %s520_s8 = smov 8  }
  0x13   :  { %39 = dma.hbm_to_vmem [thread:$0]  %s639_s2, 384, %s34_s22, [#allocation6], %s519_s7, %s519_s7, %s520_s8  }
  0x14   :  { %s521_s11 = smov [#allocation2]   ;;  %s446_s15 = scalar_lea.hbm %s637_s0, 32 }
  0x15   :  { %s19_s12 = sshll.u32 %s521_s11, 4  ;;  %p447_p8 = scmp.ne.s32.totalorder %s637_s0, %s446_s15  ;;  %s20_s12 = int_to_ptr.vmem [resolvable:$true] %s19_s12 }
  0x16   :  { %p450_p9 = scmp.lt.u32.totalorder %s446_s15, %s637_s0 }
  0x18   :  { %p452_p10 = pnand %p450_p9, %p447_p8 }
  0x1a   :  { %455 = shalt.err (!%p452_p10)
}
  0x1b   :  { %s456_s20 = scalar_lea.vmem %s20_s12, 32  ;;  %s460_s2 = scalar_lea.vmem %s20_s12, 128 }
  0x1c   :  { %p457_p11 = scmp.ne.s32.totalorder %s20_s12, %s456_s20  ;;  %p461_p12 = scmp.lt.s32.totalorder %s20_s12, %s20_s12 }
  0x1d   :  { %p462_p13 = scmp.lt.s32.totalorder %s460_s2, %s456_s20 }
  0x1f   :  { %p463_p0 = por %p462_p13, %p461_p12 }
  0x21   :  { %p464_p1 = pnand %p463_p0, %p457_p11 }
  0x23   :  { %467 = shalt.err (!%p464_p1)
}
  0x24   :  { %s522_s21 = smov 32   ;;  %s523_s22 = smov 2  }
  0x25   :  { %25 = dma.hbm_to_vmem [thread:$0]  %s637_s0, 32, %s20_s12, [#allocation3], %s522_s21, %s522_s21, %s523_s22  }
  0x26   :  { %s524_s25 = smov [#allocation7]   ;;  %s468_s29 = scalar_lea.hbm %s641_s4, 2048 }
  0x27   :  { %s47_s26 = sshll.u32 %s524_s25, 4  ;;  %p469_p2 = scmp.ne.s32.totalorder %s641_s4, %s468_s29  ;;  %s48_s26 = int_to_ptr.vmem [resolvable:$true] %s47_s26 }
  0x28   :  { %p472_p3 = scmp.lt.u32.totalorder %s468_s29, %s641_s4 }
  0x2a   :  { %p474_p4 = pnand %p472_p3, %p469_p2 }
  0x2c   :  { %477 = shalt.err (!%p474_p4)
}
  0x2d   :  { %s478_s13 = scalar_lea.vmem %s48_s26, 2048  ;;  %p483_p6 = scmp.lt.s32.totalorder %s48_s26, %s48_s26 }
  0x2e   :  { %p479_p5 = scmp.ne.s32.totalorder %s48_s26, %s478_s13  ;;  %p484_p7 = scmp.lt.s32.totalorder %s478_s13, %s478_s13 }
  0x30   :  { %p485_p8 = por %p484_p7, %p483_p6 }
  0x32   :  { %p486_p9 = pnand %p485_p8, %p479_p5 }
  0x34   :  { %489 = shalt.err (!%p486_p9)
}
  0x35   :  { %53 = dma.hbm_to_vmem [thread:$0]  %s641_s4, 2048, %s48_s26, [#allocation6], %s519_s7, %s519_s7, %s520_s8  }
  0x36   :  { %512 = dma.done.wait [#allocation3], 128  }
  0x37   :  { %513 = vsyncadd [#allocation3], 4294967168 }
  0x38   :  { %514 = dma.done.wait [#allocation6], 2432  }
  0x39   :  { %515 = vsyncadd [#allocation6], 4294964864  ;;  %v525_v0 = vmov 0   ;;  %v74_v1 = vld [vmem:[%s638_s1] sm:$0x3]  ;;  %v108_v13 = vld [vmem:[#allocation5 + $0x10] sm:$0xff]  ;;  %v111_v58 = vlaneseq }
  0x3a   :  { %179 = vmatprep.mubr.bf16.mxu0 %v525_v0  ;;  %v75_v2 = vld [vmem:[%s638_s1 + $0x2] sm:$0x3]  ;;  %v76_v3 = vld [vmem:[%s638_s1 + $0x4] sm:$0x3]  ;;  %v77_v4 = vld [vmem:[%s638_s1 + $0x6] sm:$0x3]  ;;  %v78_v5 = vunpack.c.l.bf16 %v74_v1  ;;  %v313_v16 = vcombine.high %v108_v13, %v108_v13  ;;  %v312_v17 = vcombine.low %v108_v13, %v108_v13 }
  0x3b   :  { %v79_v6 = vunpack.c.l.bf16 %v75_v2  ;;  %v80_v7 = vunpack.c.l.bf16 %v76_v3  ;;  %v81_v8 = vunpack.c.l.bf16 %v77_v4  ;;  %v419_v9 = vld [vmem:[#allocation5 + $0x4] ss:$8 sps:$4 sm:$0xff]   ;;  %v421_v10 = vld [vmem:[#allocation5] ss:$8 sps:$4 sm:$0xff]   ;;  %vm140_vm0 = vcmask 1043456   ;;  %v192_v14 = vld [vmem:[#allocation7] sm:$0xff] }
  0x3c   :  { %147 = vmatprep.subr.bf16.mxu0 %v419_v9  ;;  %v193_v15 = vld [vmem:[#allocation7 + $0x8] sm:$0xff]  ;;  %v194_v19 = vld [vmem:[#allocation7 + $0x10] sm:$0xff]  ;;  %v195_v20 = vld [vmem:[#allocation7 + $0x18] sm:$0xff]  ;;  %v142_v25 = vsel %vm140_vm0, %v312_v17, 0  ;;  %s526_s1 = smov 16   ;;  %vm102_vm1 = vcmask 130048  }
  0x3d   :  { %v94_v11 = vcombine.low %v78_v5, %v79_v6  ;;  %v95_v12 = vcombine.low %v80_v7, %v81_v8  ;;  %148 = vmatpush1.bf16.msra.mxu0 %v421_v10  ;;  %v370_v18 = vpack.c.bf16 %v193_v15, %v192_v14  ;;  %v374_v22 = vpack.c.bf16 %v195_v20, %v194_v19  ;;  %v196_v23 = vld [vmem:[#allocation7 + $0x20] sm:$0xff]  ;;  %v197_v24 = vld [vmem:[#allocation7 + $0x28] sm:$0xff]  ;;  %v198_v27 = vld [vmem:[#allocation7 + $0x30] sm:$0xff] }
  0x3e   :  { %314 = vmatprep.subr.msk.bf16.mxu0 %vm140_vm0, %v313_v16  ;;  %v378_v26 = vpack.c.bf16 %v197_v24, %v196_v23  ;;  %v199_v28 = vld [vmem:[#allocation7 + $0x38] sm:$0xff]  ;;  %v200_v30 = vld [vmem:[#allocation7 + $0x40] sm:$0xff]  ;;  %v201_v31 = vld [vmem:[#allocation7 + $0x48] sm:$0xff]  ;;  %vm136_vm2 = vcmask 195584   ;;  %v112_v59 = vshrl.u32 %v111_v58, 7 }
  0x3f   :  { %v414_v21 = vpack.i.bf16 %v95_v12, %v94_v11  ;;  %371 = vmatprep.subr.bf16.mxu1 %v370_v18  ;;  %v382_v29 = vpack.c.bf16 %v199_v28, %v198_v27  ;;  %v386_v32 = vpack.c.bf16 %v201_v31, %v200_v30  ;;  %v202_v33 = vld [vmem:[#allocation7 + $0x50] sm:$0xff]  ;;  %v203_v34 = vld [vmem:[#allocation7 + $0x58] sm:$0xff]  ;;  %v66_v36 = vld [vmem:[#allocation2] sm:$0x3] }
  0x40   :  { %373 = vmatpush3.bf16.msra.mxu1 %v370_v18  ;;  %v390_v35 = vpack.c.bf16 %v203_v34, %v202_v33  ;;  %v67_v37 = vld [vmem:[#allocation2 + $0x2] sm:$0x3]  ;;  %v68_v38 = vld [vmem:[#allocation2 + $0x4] sm:$0x3]  ;;  %v69_v39 = vld [vmem:[#allocation2 + $0x6] sm:$0x3]  ;;  %v70_v40 = vunpack.c.l.bf16 %v66_v36 }
  0x41   :  { %415 = vrot.lane.b32.xlu0 %v414_v21, %s526_s1  ;;  %150 = vmatpush1.bf16.msra.mxu0 %v142_v25  ;;  %v71_v41 = vunpack.c.l.bf16 %v67_v37  ;;  %v72_v42 = vunpack.c.l.bf16 %v68_v38  ;;  %v73_v43 = vunpack.c.l.bf16 %v69_v39  ;;  %v204_v52 = vld [vmem:[#allocation7 + $0x60] sm:$0xff]  ;;  %v205_v53 = vld [vmem:[#allocation7 + $0x68] sm:$0xff]  ;;  %v206_v55 = vld [vmem:[#allocation7 + $0x70] sm:$0xff]  ;;  %v113_v60 = vsub.s32 0, %v112_v59 }
  0x42   :  { %375 = vmatprep.subr.bf16.mxu1 %v374_v22  ;;  %v394_v54 = vpack.c.bf16 %v205_v53, %v204_v52  ;;  %v207_v56 = vld [vmem:[#allocation7 + $0x78] sm:$0xff]  ;;  %v109_v61 = vld [vmem:[%s640_s3] sm:$0x3]  ;;  %v117_v62 = vsub.s32 1, %v112_v59 }
  0x43   :  { %v86_v44 = vcombine.low %v70_v40, %v71_v41  ;;  %v87_v45 = vcombine.low %v72_v42, %v73_v43  ;;  %v398_v57 = vpack.c.bf16 %v207_v56, %v206_v55  ;;  %v114_v63 = vrot.slane %v109_v61, %v113_v60  ;;  %v316_v11 = vld [vmem:[%s642_s5] ss:$0 sm:$0xff] }
  0x44   :  { %377 = vmatpush3.bf16.msra.mxu1 %v374_v22  ;;  %v118_v0 = vrot.slane %v109_v61, %v117_v62 }
  0x45   :  { %379 = vmatprep.subr.bf16.mxu1 %v378_v26 }
  0x48   :  { %381 = vmatpush3.bf16.msra.mxu1 %v378_v26 }
  0x49   :  { %383 = vmatprep.subr.bf16.mxu1 %v382_v29 }
  0x4c   :  { %385 = vmatpush3.bf16.msra.mxu1 %v382_v29 }
  0x4d   :  { %387 = vmatprep.subr.bf16.mxu1 %v386_v32 }
  0x50   :  { %389 = vmatpush3.bf16.msra.mxu1 %v386_v32 }
  0x51   :  { %391 = vmatprep.subr.bf16.mxu1 %v390_v35 }
  0x54   :  { %393 = vmatpush3.bf16.msra.mxu1 %v390_v35 }
  0x55   :  { %395 = vmatprep.subr.bf16.mxu1 %v394_v54 }
  0x58   :  { %397 = vmatpush3.bf16.msra.mxu1 %v394_v54 }
  0x59   :  { %399 = vmatprep.subr.bf16.mxu1 %v398_v57 }
  0x5c   :  { %401 = vmatpush3.bf16.msra.mxu1 %v398_v57 }
  0xb3   :  { %v416_v46 = vpop.permute.xlu0 %415 }
  0xb4   :  { %v418_v47 = vunpack.i.h.bf16 %v416_v46  ;;  %v417_v48 = vunpack.i.l.bf16 %v416_v46 }
  0xb6   :  { %v103_v49 = vsel %vm102_vm1, %v86_v44, %v417_v48  ;;  %v104_v50 = vsel %vm102_vm1, %v87_v45, %v418_v47 }
  0xb7   :  { %v105_v51 = vpack.c.bf16 %v104_v50, %v103_v49 }
  0xb9   :  { %315 = vmatmul.mubr.msk.bf16.vlgmr.msra.gmra.mrb[0].mxu0 %vm136_vm2, %v105_v51 }
 0x18c   :  { %v181_v1 = vpop.f32.mrb[0].mxu0 }
 0x18d   :  { %v182_v2 = vadd.f32 %v181_v1, %v114_v63  ;;  %v183_v3 = vpop.f32.mrb[1].mxu0 }
 0x18e   :  { %v184_v4 = vadd.f32 %v183_v3, %v118_v0  ;;  %v185_v5 = vpop.f32.mrb[2].mxu0 }
 0x18f   :  { %v186_v6 = vadd.f32 %v185_v5, %v114_v63  ;;  %v187_v7 = vpop.f32.mrb[3].mxu0 }
 0x190   :  { %v188_v8 = vadd.f32 %v187_v7, %v118_v0  ;;  %v190_v9 = vmul.f32 %v184_v4, %v182_v2 }
 0x192   :  { %v191_v10 = vmul.f32 %v188_v8, %v186_v6  ;;  %367 = vmatprep.mubr.f32.mxu1 %v190_v9 }
 0x194   :  { %368 = vmatmul.mubr.f32.vlgmr.msra.gmra.mrb[0].mxu1 %v191_v10 }
 0x267   :  { %v369_v12 = vpop.f32.mrb[0].mxu1 }
 0x268   :  { %v287_v13 = vadd.f32 %v369_v12, %v316_v11  ;;  %v281_v14 = vpop.f32.mrb[1].mxu1 }
 0x269   :  { %v282_v15 = vadd.f32 %v316_v11, %v281_v14 }
 0x26a   :  { %291 = vst [vmem:[#allocation8 + $0x8] sm:$0xff] %v287_v13 }
 0x26b   :  { %290 = vst [vmem:[#allocation8] sm:$0xff] %v282_v15 }
 0x26c   :  { %296 = vsyncadd [#allocation4], 192  ;;  %s527_s3 = smov [#allocation8]  }
 0x26d   :  { %s297_s22 = sshll.u32 %s527_s3, 4  ;;  %s298_s22 = int_to_ptr.vmem [resolvable:$true] %s297_s22 }
 0x26e   :  { %s490_s23 = scalar_lea.vmem %s298_s22, 64  ;;  %s494_s24 = scalar_lea.vmem %s298_s22, 256 }
 0x26f   :  { %p491_p10 = scmp.ne.s32.totalorder %s298_s22, %s490_s23  ;;  %p495_p11 = scmp.lt.s32.totalorder %s298_s22, %s298_s22 }
 0x270   :  { %p496_p12 = scmp.lt.s32.totalorder %s494_s24, %s490_s23 }
 0x272   :  { %p497_p13 = por %p496_p12, %p495_p11 }
 0x274   :  { %p498_p0 = pnand %p497_p13, %p491_p10 }
 0x276   :  { %501 = shalt.err (!%p498_p0)
}
 0x277   :  { %s502_s26 = scalar_lea.hbm %s643_s6, 64 }
 0x278   :  { %p503_p1 = scmp.ne.s32.totalorder %s643_s6, %s502_s26  ;;  %p506_p2 = scmp.lt.u32.totalorder %s502_s26, %s643_s6 }
 0x27a   :  { %p508_p3 = pnand %p506_p2, %p503_p1 }
 0x27c   :  { %511 = shalt.err (!%p508_p3)
}
 0x27d   :  { %s528_s9 = smov 64   ;;  %s529_s10 = smov 4  }
 0x27e   :  { %303 = dma.vmem_to_hbm [thread:$0]  %s298_s22, 64, %s643_s6, [#allocation4], %s528_s9, %s528_s9, %s529_s10  }
 0x27f   :  { %516 = dma.done.wait [#allocation4], 256  }
 0x280   :  { %517 = vsyncadd [#allocation4], 4294967040 }
 0x281   :  { %307 = vsyncpa [#allocation3], 1 }
 0x282   :  { %308 = vsyncpa [#allocation6], 1 }
 0x283   :  { %309 = vsyncpa [#allocation4], 1 }

</bundles_post_ra>
